<compile_context>
chip_gen: v7x
topology: tpu7x:2x2x1
jax: 0.10.0
libtpu: 0.0.40
codegen_flags: <defaults>
</compile_context>

<pallas_src>
import jax
import jax.numpy as jnp
from jax.experimental import pallas as pl
from jax.experimental.pallas import tpu as pltpu


def attention_kernel(x_ref, w_ref, ws_ref, aw_ref):
    # x_ref : (TB, S, H)  block of batch rows
    # w_ref : (1, H)      Linear weight, resident in VMEM for the whole grid
    # ws_ref: (TB, H)     weighted-sum output (lane-dense over H)
    # aw_ref: (TB, S)     attention-weights output (lane-dense over S)
    x = x_ref[...]                                     # native dtype (no f32 copy)
    w = w_ref[...].astype(x.dtype)                     # (1, H) -> broadcasts on lanes

    # scores[b, s] = <x[b, s, :], w>  — VPU multiply + XLU lane reduce, f32 accum.
    # keepdims keeps everything in x's (sublane=S, lane=H) layout: (TB, S, 1).
    scores = jnp.sum(x * w, axis=-1, keepdims=True, dtype=jnp.float32)  # (TB, S, 1)

    # Numerically stable softmax over the sequence (sublane) axis, exact divide.
    m = jnp.max(scores, axis=1, keepdims=True)         # (TB, 1, 1)
    e = jnp.exp(scores - m)                            # (TB, S, 1)
    denom = jnp.sum(e, axis=1, keepdims=True)          # (TB, 1, 1)
    p = e / denom                                      # (TB, S, 1), exact

    # Weighted sum over the sequence axis; multiply in x's dtype, accumulate f32.
    pooled = jnp.sum(x * p.astype(x.dtype), axis=1, dtype=jnp.float32)  # (TB, H)

    ws_ref[...] = pooled.astype(ws_ref.dtype)
    aw_ref[...] = p[..., 0].astype(aw_ref.dtype)       # single relayout to (TB, S)


def _vmem_policy():
    """Per-generation (block_budget_bytes, vmem_limit_bytes, multi_tc)."""
    vmem_cap = None
    try:
        vmem_cap = pltpu.get_tpu_info().vmem_capacity_bytes
    except Exception:
        pass
    if vmem_cap is not None and vmem_cap <= (96 << 20):
        # v7x-class: 64 MiB VMEM per TensorCore, 2 TensorCores per chip.
        return (6 << 20), (40 << 20), True
    if vmem_cap is not None:
        # v5e / v6e: 128 MiB VMEM, single TensorCore -> big streaming blocks.
        return (14 << 20), (80 << 20), False
    # Unknown backend (e.g. interpret mode): conservative, single-core defaults.
    return (6 << 20), (32 << 20), False


def _pick_batch_tile(B, S, H, itemsize, vmem_block_budget, multi_tc):
    """Largest batch tile whose on-chip footprint (double-buffered input block +
    f32 softmax temps) fits the per-generation block budget; multiples of 8 for
    partial blocks, and an even number of grid blocks on 2-TensorCore chips."""
    row_bytes = 2 * S * H * itemsize + 4 * (S + H)     # 2x: pipeline double-buffer
    tb = max(1, min(B, vmem_block_budget // max(1, row_bytes)))
    if tb < B:
        tb = max(8, (tb // 8) * 8)                     # keep partial blocks (8,*)-legal
    if multi_tc and B >= 16:
        if tb >= B:                                    # split so both TCs get work
            tb = max(8, (((B + 1) // 2) // 8) * 8)
        while tb > 8 and pl.cdiv(B, tb) % 2 != 0:      # even block count => balance
            tb -= 8
    return tb


def attention_forward(lstm_output, weight):
    """lstm_output: (B, S, H); weight: (1, H) == nn.Linear(H, 1, bias=False).weight."""
    B, S, H = lstm_output.shape
    itemsize = jnp.dtype(lstm_output.dtype).itemsize

    block_budget, vmem_limit, multi_tc = _vmem_policy()
    tb = _pick_batch_tile(B, S, H, itemsize, block_budget, multi_tc)
    grid = (pl.cdiv(B, tb),)

    cost = pl.CostEstimate(
        flops=4 * B * S * H,                                   # score + weighted sum
        transcendentals=B * S,                                 # exp in softmax
        bytes_accessed=B * S * H * itemsize                    # lstm_output read
        + (B * H + B * S) * itemsize                           # two outputs
        + H * itemsize,                                        # weight
    )

    ws, aw = pl.pallas_call(
        attention_kernel,
        out_shape=(
            jax.ShapeDtypeStruct((B, H), lstm_output.dtype),   # weighted_sum
            jax.ShapeDtypeStruct((B, S), lstm_output.dtype),   # attention_weights
        ),
        grid=grid,
        in_specs=[
            pl.BlockSpec((tb, S, H), lambda b: (b, 0, 0)),
            # grid-invariant weight: whole (1, H) array resident in VMEM
            pl.BlockSpec(memory_space=pltpu.MemorySpace.VMEM),
        ],
        out_specs=(
            pl.BlockSpec((tb, H), lambda b: (b, 0)),
            pl.BlockSpec((tb, S), lambda b: (b, 0)),
        ),
        compiler_params=pltpu.CompilerParams(
            dimension_semantics=("parallel",),
            vmem_limit_bytes=vmem_limit,
        ),
        cost_estimate=cost,
    )(lstm_output, weight)
    return ws, aw


def reference_forward(lstm_output, weight):
    scores = jnp.einsum("bsh,oh->bs", lstm_output, weight)        # (B, S)
    attn = jax.nn.softmax(scores, axis=1)                         # (B, S)
    pooled = jnp.sum(lstm_output * attn[..., None], axis=1)       # (B, H)
    return pooled, attn


if __name__ == "__main__":
    B, S, H = 2, 8, 32  # batch, seq, attention_size

    key = jax.random.PRNGKey(0)
    kx, kw = jax.random.split(key)
    lstm_output = jax.random.normal(kx, (B, S, H), dtype=jnp.float32)

    # Deterministic init matching nn.Linear(H, 1, bias=False): U(-1/sqrt(H), 1/sqrt(H))
    bound = 1.0 / (H ** 0.5)
    weight = jax.random.uniform(kw, (1, H), minval=-bound, maxval=bound,
                                dtype=jnp.float32)

    pooled, attn = attention_forward(lstm_output, weight)
    jax.block_until_ready((pooled, attn))

    ref_pooled, ref_attn = reference_forward(lstm_output, weight)
    assert jnp.allclose(pooled, ref_pooled, atol=1e-4, rtol=1e-4)
    assert jnp.allclose(attn, ref_attn, atol=1e-4, rtol=1e-4)

    print("KERNEL_OK")
</pallas_src>

<mosaic_0001>
module attributes {stable_mosaic.version = 11 : i64} {
  func.func @attention_kernel(%arg0: i32, %arg1: memref<2x8x32xf32, #tpu.memory_space<vmem>>, %arg2: memref<1x32xf32, #tpu.memory_space<vmem>>, %arg3: memref<2x32xf32, #tpu.memory_space<vmem>>, %arg4: memref<2x8xf32, #tpu.memory_space<vmem>>) attributes {dimension_semantics = [#tpu.dimension_semantics<parallel>], iteration_bounds = array<i64: 1>, scalar_prefetch = 0 : i64, scratch_operands = 0 : i64, tpu.core_type = #tpu.core_type<tc>, window_params = [{transform_indices = @transform_0, window_bounds = array<i64: 2, 8, 32>}, {pipeline_mode = #tpu.pipeline_mode<synchronous>, transform_indices = @transform_1, window_bounds = array<i64: 1, 32>}, {transform_indices = @transform_2, window_bounds = array<i64: 2, 32>}, {transform_indices = @transform_3, window_bounds = array<i64: 2, 8>}]} {
    %c0 = arith.constant 0 : index
    %c0_0 = arith.constant 0 : index
    %c0_1 = arith.constant 0 : index
    %0 = vector.load %arg1[%c0, %c0_0, %c0_1] : memref<2x8x32xf32, #tpu.memory_space<vmem>>, vector<2x8x32xf32>
    %c0_2 = arith.constant 0 : index
    %c0_3 = arith.constant 0 : index
    %1 = vector.load %arg2[%c0_2, %c0_3] : memref<1x32xf32, #tpu.memory_space<vmem>>, vector<1x32xf32>
    %2 = vector.shape_cast %1 : vector<1x32xf32> to vector<1x1x32xf32>
    %3 = vector.broadcast %2 : vector<1x1x32xf32> to vector<2x8x32xf32>
    %4 = arith.mulf %0, %3 : vector<2x8x32xf32>
    %cst = arith.constant dense<0.000000e+00> : vector<2x8xf32>
    %5 = vector.multi_reduction <add>, %4, %cst [2] : vector<2x8x32xf32> to vector<2x8xf32>
    %6 = vector.shape_cast %5 : vector<2x8xf32> to vector<2x8x1xf32>
    %cst_4 = arith.constant dense<0xFF800000> : vector<2x1xf32>
    %7 = vector.multi_reduction <maximumf>, %6, %cst_4 [1] : vector<2x8x1xf32> to vector<2x1xf32>
    %8 = vector.shape_cast %7 : vector<2x1xf32> to vector<2x1x1xf32>
    %9 = vector.broadcast %8 : vector<2x1x1xf32> to vector<2x8x1xf32>
    %10 = arith.subf %6, %9 : vector<2x8x1xf32>
    %11 = math.exp %10 : vector<2x8x1xf32>
    %cst_5 = arith.constant dense<0.000000e+00> : vector<2x1xf32>
    %12 = vector.multi_reduction <add>, %11, %cst_5 [1] : vector<2x8x1xf32> to vector<2x1xf32>
    %13 = vector.shape_cast %12 : vector<2x1xf32> to vector<2x1x1xf32>
    %14 = vector.broadcast %13 : vector<2x1x1xf32> to vector<2x8x1xf32>
    %15 = arith.divf %11, %14 : vector<2x8x1xf32>
    %16 = vector.broadcast %15 : vector<2x8x1xf32> to vector<2x8x32xf32>
    %17 = arith.mulf %0, %16 : vector<2x8x32xf32>
    %cst_6 = arith.constant dense<0.000000e+00> : vector<2x32xf32>
    %18 = vector.multi_reduction <add>, %17, %cst_6 [1] : vector<2x8x32xf32> to vector<2x32xf32>
    %c0_7 = arith.constant 0 : index
    %c0_8 = arith.constant 0 : index
    %19 = vector.load %arg3[%c0_7, %c0_8] : memref<2x32xf32, #tpu.memory_space<vmem>>, vector<2x32xf32>
    tpu.vector_store %arg3[%c0_7, %c0_8], %18 {strides = array<i32>} : memref<2x32xf32, #tpu.memory_space<vmem>>, vector<2x32xf32>,
    %20 = vector.shape_cast %15 : vector<2x8x1xf32> to vector<2x8xf32>
    %c0_9 = arith.constant 0 : index
    %c0_10 = arith.constant 0 : index
    %21 = vector.load %arg4[%c0_9, %c0_10] : memref<2x8xf32, #tpu.memory_space<vmem>>, vector<2x8xf32>
    tpu.vector_store %arg4[%c0_9, %c0_10], %20 {strides = array<i32>} : memref<2x8xf32, #tpu.memory_space<vmem>>, vector<2x8xf32>,
    return
  }
  func.func @transform_0(%arg0: i32) -> (i32, i32, i32) {
    %c0_i32 = arith.constant 0 : i32
    %c0_i32_0 = arith.constant 0 : i32
    %c0_i32_1 = arith.constant 0 : i32
    return %arg0, %c0_i32, %c0_i32_0 : i32, i32, i32
  }
  func.func @transform_1(%arg0: i32) -> (i32, i32) {
    %c0_i32 = arith.constant 0 : i32
    %c0_i32_0 = arith.constant 0 : i32
    %c0_i32_1 = arith.constant 0 : i32
    return %c0_i32, %c0_i32_0 : i32, i32
  }
  func.func @transform_2(%arg0: i32) -> (i32, i32) {
    %c0_i32 = arith.constant 0 : i32
    %c0_i32_0 = arith.constant 0 : i32
    return %arg0, %c0_i32 : i32, i32
  }
  func.func @transform_3(%arg0: i32) -> (i32, i32) {
    %c0_i32 = arith.constant 0 : i32
    %c0_i32_0 = arith.constant 0 : i32
    return %arg0, %c0_i32 : i32, i32
  }
}

</mosaic_0001>

<bundles_post_ra>
// kernel: tpu_custom_call.1
= control target key start
LH: loop header
LB: loop body
LE: loop exit
PB: predicated region body
PF: predicated region fallthrough
CT: control target
= control target key end

     0   :  { %9 = vsyncpa [#allocation3], 0  ;;  %s305_s0 = inlined_call_operand.hbm [shape: f32[2,8,32], index: 0, kind: input, shape index: {}]   ;;  %s306_s1 = inlined_call_operand.vmem [shape: f32[1,32], index: 1, kind: input, shape index: {}]   ;;  %s307_s2 = inlined_call_operand.hbm [shape: f32[2,32], index: 2, kind: output, shape index: {0}]   ;;  %s308_s3 = inlined_call_operand.hbm [shape: f32[2,8], index: 3, kind: output, shape index: {1}]  }
   0x1   :  { %10 = vsyncpa [#allocation4], 0 }
   0x2   :  { %11 = vsyncpa [#allocation7], 0  ;;  %s235_s12 = smov [#allocation2]   ;;  %s163_s16 = scalar_lea.hbm %s305_s0, 256 }
   0x3   :  { %s17_s13 = sshll.u32 %s235_s12, 4  ;;  %p164_p0 = scmp.ne.s32.totalorder %s305_s0, %s163_s16  ;;  %s18_s13 = int_to_ptr.vmem [resolvable:$true] %s17_s13 }
   0x4   :  { %p167_p1 = scmp.lt.u32.totalorder %s163_s16, %s305_s0 }
   0x6   :  { %p169_p2 = pnand %p167_p1, %p164_p0 }
   0x8   :  { %172 = shalt.err (!%p169_p2)
}
   0x9   :  { %s173_s21 = scalar_lea.vmem %s18_s13, 256  ;;  %p178_p4 = scmp.lt.s32.totalorder %s18_s13, %s18_s13 }
   0xa   :  { %p174_p3 = scmp.ne.s32.totalorder %s18_s13, %s173_s21  ;;  %p179_p5 = scmp.lt.s32.totalorder %s173_s21, %s173_s21 }
   0xc   :  { %p180_p6 = por %p179_p5, %p178_p4 }
   0xe   :  { %p181_p7 = pnand %p180_p6, %p174_p3 }
  0x10   :  { %184 = shalt.err (!%p181_p7)
}
  0x11   :  { %s236_s22 = smov 128   ;;  %s237_s23 = smov 8  }
  0x12   :  { %23 = dma.hbm_to_vmem [thread:$0]  %s305_s0, 256, %s18_s13, [#allocation3], %s236_s22, %s236_s22, %s237_s23  }
  0x13   :  { %229 = dma.done.wait [#allocation3], 256  }
  0x14   :  { %230 = vsyncadd [#allocation3], 4294967040  ;;  %v29_v0 = vld [vmem:[#allocation2] sm:$0xff]  ;;  %vm40_vm0 = vcmask 261120   ;;  %v30_v2 = vld [vmem:[#allocation2 + $0x8] sm:$0xff]  ;;  %v106_v39 = vlaneseq  ;;  %s238_s0 = smov [#allocation6]  }
  0x15   :  { %v149_v1 = vld [vmem:[%s306_s1] ss:$0 sm:$0xff]  ;;  %s136_s1 = sshll.u32 %s238_s0, 4  ;;  %vm99_vm1 = vcmask 1041409   ;;  %vm118_vm2 = vcmask 58368   ;;  %s137_s1 = int_to_ptr.vmem [resolvable:$true] %s136_s1 }
  0x16   :  { %v38_v3 = vmul.f32 %v149_v1, %v29_v0  ;;  %v39_v4 = vmul.f32 %v149_v1, %v30_v2  ;;  %v107_v40 = vand.u32 127, %v106_v39  ;;  %v109_v41 = vshrl.u32 %v106_v39, 7  ;;  %s185_s28 = scalar_lea.vmem %s137_s1, 32  ;;  %p190_p9 = scmp.lt.s32.totalorder %s137_s1, %s137_s1 }
  0x17   :  { %p186_p8 = scmp.ne.s32.totalorder %s137_s1, %s185_s28  ;;  %p191_p10 = scmp.lt.s32.totalorder %s185_s28, %s185_s28 }
  0x18   :  { %v41_v5 = vsel %vm40_vm0, %v38_v3, 0.0  ;;  %v44_v6 = vsel %vm40_vm0, %v39_v4, 0.0  ;;  %v110_v45 = vsub.s32 %v107_v40, %v109_v41 }
  0x19   :  { %42 = vadd.xlane.f32.xlu0 %v41_v5  ;;  %p192_p11 = por %p191_p10, %p190_p9 }
  0x1b   :  { %p193_p12 = pnand %p192_p11, %p186_p8 }
  0x1d   :  { %45 = vadd.xlane.f32.xlu0 %v44_v6 }
  0xa6   :  { %v43_v7 = vpop.xlane.xlu0 %42 }
  0xa7   :  { %v47_v8 = vrot.slane %v43_v7, 4 }
  0xa9   :  { %v48_v9 = vmax.f32 %v43_v7, %v47_v8 }
  0xaa   :  { %v46_v10 = vpop.xlane.xlu0 %45 }
  0xab   :  { %v49_v11 = vrot.slane %v48_v9, 2  ;;  %v53_v12 = vrot.slane %v46_v10, 4 }
  0xad   :  { %v50_v13 = vmax.f32 %v48_v9, %v49_v11  ;;  %v54_v14 = vmax.f32 %v46_v10, %v53_v12 }
  0xaf   :  { %v51_v15 = vrot.slane %v50_v13, 1  ;;  %v55_v16 = vrot.slane %v54_v14, 2 }
  0xb1   :  { %v52_v17 = vmax.f32 %v50_v13, %v51_v15  ;;  %v56_v18 = vmax.f32 %v54_v14, %v55_v16 }
  0xb3   :  { %v59_v19 = vsub.f32 %v43_v7, %v52_v17  ;;  %v57_v20 = vrot.slane %v56_v18, 1 }
  0xb5   :  { %v61_v21 = vmul.f32 1.442695, %v59_v19  ;;  %v58_v22 = vmax.f32 %v56_v18, %v57_v20 }
  0xb7   :  { %155 = vpow2.f32 %v61_v21  ;;  %v60_v23 = vsub.f32 %v46_v10, %v58_v22 }
  0xb9   :  { %v63_v24 = vmul.f32 1.442695, %v60_v23 }
  0xbb   :  { %157 = vpow2.f32 %v63_v24 }
  0xc1   :  { %v156_v25 = vpop.eup %155 }
  0xc2   :  { %v65_v26 = vrot.slane %v156_v25, 4 }
  0xc4   :  { %v66_v27 = vadd.f32 %v156_v25, %v65_v26 }
  0xc5   :  { %v158_v28 = vpop.eup %157 }
  0xc6   :  { %v67_v29 = vrot.slane %v66_v27, 2  ;;  %v71_v30 = vrot.slane %v158_v28, 4 }
  0xc8   :  { %v72_v31 = vadd.f32 %v158_v28, %v71_v30  ;;  %v68_v32 = vadd.f32 %v67_v29, %v66_v27 }
  0xca   :  { %v73_v33 = vrot.slane %v72_v31, 2  ;;  %v69_v34 = vrot.slane %v68_v32, 1 }
  0xcc   :  { %v74_v35 = vadd.f32 %v73_v33, %v72_v31  ;;  %v70_v36 = vadd.f32 %v69_v34, %v68_v32 }
  0xce   :  { %v75_v37 = vrot.slane %v74_v35, 1  ;;  %159 = vrcp.f32 %v70_v36 }
  0xd0   :  { %v76_v38 = vadd.f32 %v75_v37, %v74_v35 }
  0xd2   :  { %161 = vrcp.f32 %v76_v38 }
  0xd8   :  { %v160_v42 = vpop.eup %159 }
  0xd9   :  { %v78_v43 = vmul.f32 %v160_v42, %v156_v25 }
  0xdb   :  { %v81_v44 = vmul.f32 %v78_v43, %v29_v0  ;;  %v111_v51 = vrot.slane %v78_v43, %v110_v45 }
  0xdc   :  { %v162_v46 = vpop.eup %161 }
  0xdd   :  { %v80_v47 = vmul.f32 %v162_v46, %v158_v28  ;;  %v83_v48 = vsel %vm40_vm0, %v81_v44, 0.0 }
  0xde   :  { %v84_v49 = vrot.slane %v83_v48, 4 }
  0xdf   :  { %v82_v50 = vmul.f32 %v80_v47, %v30_v2  ;;  %v115_v52 = vrot.slane %v80_v47, %v110_v45 }
  0xe0   :  { %v85_v53 = vadd.f32 %v84_v49, %v83_v48 }
  0xe1   :  { %v90_v54 = vsel %vm40_vm0, %v82_v50, 0.0  ;;  %v116_v55 = vsel %vm99_vm1, %v115_v52, %v111_v51 }
  0xe2   :  { %v86_v56 = vrot.slane %v85_v53, 2  ;;  %v91_v57 = vrot.slane %v90_v54, 4  ;;  %119 = vst.msk [vmem:[#allocation6] sm:$0x3] %vm118_vm2, %v116_v55 }
  0xe3   :  { %196 = shalt.err (!%p193_p12)
}
  0xe4   :  { %s197_s4 = scalar_lea.hbm %s308_s3, 32 }
  0xe5   :  { %p198_p13 = scmp.ne.s32.totalorder %s308_s3, %s197_s4  ;;  %p201_p0 = scmp.lt.u32.totalorder %s197_s4, %s308_s3 }
  0xe7   :  { %p203_p1 = pnand %p201_p0, %p198_p13 }
  0xe9   :  { %206 = shalt.err (!%p203_p1)
}
  0xea   :  { %139 = dma.vmem_to_hbm [thread:$0]  %s137_s1, 32, %s308_s3, [#allocation7]   ;;  %v87_v58 = vadd.f32 %v86_v56, %v85_v53  ;;  %v92_v59 = vadd.f32 %v91_v57, %v90_v54  ;;  %vm102_vm3 = vcmask 254976  }
  0xeb   :  { %s239_s11 = smov [#allocation5]  }
  0xec   :  { %v93_v60 = vrot.slane %v92_v59, 2  ;;  %v88_v61 = vrot.slane %v87_v58, 1  ;;  %s126_s12 = sshll.u32 %s239_s11, 4  ;;  %s127_s12 = int_to_ptr.vmem [resolvable:$true] %s126_s12 }
  0xed   :  { %s207_s13 = scalar_lea.vmem %s127_s12, 32  ;;  %p212_p3 = scmp.lt.s32.totalorder %s127_s12, %s127_s12 }
  0xee   :  { %v94_v62 = vadd.f32 %v93_v60, %v92_v59  ;;  %v89_v0 = vadd.f32 %v88_v61, %v87_v58  ;;  %p208_p2 = scmp.ne.s32.totalorder %s127_s12, %s207_s13  ;;  %p213_p4 = scmp.lt.s32.totalorder %s207_s13, %s207_s13 }
  0xf0   :  { %v95_v63 = vrot.slane %v94_v62, 1  ;;  %p214_p5 = por %p213_p4, %p212_p3 }
  0xf2   :  { %v96_v1 = vadd.f32 %v95_v63, %v94_v62  ;;  %p215_p6 = pnand %p214_p5, %p208_p2 }
  0xf4   :  { %v100_v2 = vsel %vm99_vm1, %v96_v1, %v89_v0 }
  0xf5   :  { %103 = vst.msk [vmem:[#allocation5] sm:$0x3] %vm102_vm3, %v100_v2 }
  0xf6   :  { %218 = shalt.err (!%p215_p6)
}
  0xf7   :  { %s219_s15 = scalar_lea.hbm %s307_s2, 32 }
  0xf8   :  { %p220_p7 = scmp.ne.s32.totalorder %s307_s2, %s219_s15  ;;  %p223_p8 = scmp.lt.u32.totalorder %s219_s15, %s307_s2 }
  0xfa   :  { %p225_p9 = pnand %p223_p8, %p220_p7 }
  0xfc   :  { %228 = shalt.err (!%p225_p9)
}
  0xfd   :  { %129 = dma.vmem_to_hbm [thread:$0]  %s127_s12, 32, %s307_s2, [#allocation4]  }
  0xfe   :  { %231 = dma.done.wait [#allocation4], 32  }
  0xff   :  { %232 = vsyncadd [#allocation4], 4294967264 }
 0x100   :  { %233 = dma.done.wait [#allocation7], 32  }
 0x101   :  { %234 = vsyncadd [#allocation7], 4294967264 }
 0x102   :  { %146 = vsyncpa [#allocation3], 1 }
 0x103   :  { %147 = vsyncpa [#allocation4], 1 }
 0x104   :  { %148 = vsyncpa [#allocation7], 1 }

</bundles_post_ra>
